<compile_context>
chip_gen: v7x
topology: tpu7x:2x2x1
jax: 0.10.0
libtpu: 0.0.40
codegen_flags: <defaults>
</compile_context>

<pallas_src>
import jax
import jax.numpy as jnp
from jax import lax
from jax.experimental import pallas as pl
from jax.experimental.pallas import tpu as pltpu

_LANES = 128
_SUBLANES = 8
_TILE_BYTES = 4 * 1024 * 1024    # per-input HBM bytes per grid step
_SLAB_ROWS = 256                 # in-kernel accumulation slab (bounds live ranges)
_VMEM_LIMIT = 32 * 1024 * 1024   # 2 inputs x 2 buffers x 4 MiB = 16 MiB + headroom


def _round_up(v, m):
    return ((v + m - 1) // m) * m


def _make_kernel(tile_rows, blocks_per_split, num_splits, total_blocks, total_rows):
    has_ragged = (total_rows % tile_rows) != 0
    last_block_row0 = (total_blocks - 1) * tile_rows  # static

    def block_sum(x_ref, t_ref, masked):
        slab = min(_SLAB_ROWS, tile_rows)
        nslabs, rem = divmod(tile_rows, slab)

        def slab_sum(r_start, nrows, acc):
            xd = x_ref[pl.ds(r_start, nrows), :].astype(jnp.float32)
            td = t_ref[pl.ds(r_start, nrows), :].astype(jnp.float32)
            d = xd - td
            if masked:
                # Only the ragged last block of the whole grid pays this.
                rid = lax.broadcasted_iota(jnp.int32, (nrows, _LANES), 0) + r_start
                d = jnp.where(last_block_row0 + rid < total_rows, d, 0.0)
            sq = d * d
            # (nrows,128) -> (8,128) with plain vector adds (no cross-lane reduce).
            return acc + sq.reshape(nrows // _SUBLANES, _SUBLANES, _LANES).sum(axis=0)

        acc = jnp.zeros((_SUBLANES, _LANES), jnp.float32)
        if nslabs > 1:
            acc = lax.fori_loop(
                0, nslabs,
                lambda j, a: slab_sum(pl.multiple_of(j * slab, slab), slab, a),
                acc)
        elif nslabs == 1:
            acc = slab_sum(0, slab, acc)
        if rem:
            acc = slab_sum(nslabs * slab, rem, acc)
        return acc

    def kernel(x_ref, t_ref, o_ref):
        c = pl.program_id(0)
        i = pl.program_id(1)

        @pl.when(i == 0)
        def _():
            o_ref[...] = jnp.zeros_like(o_ref)

        if has_ragged:
            is_last = jnp.logical_and(c == num_splits - 1, i == blocks_per_split - 1)

            @pl.when(jnp.logical_not(is_last))
            def _():
                o_ref[...] += block_sum(x_ref, t_ref, masked=False)

            @pl.when(is_last)
            def _():
                o_ref[...] += block_sum(x_ref, t_ref, masked=True)
        else:
            o_ref[...] += block_sum(x_ref, t_ref, masked=False)

    return kernel


def _sq_diff_sum(x, t, *, tile_bytes=_TILE_BYTES):
    """sum((x - t)^2) over all elements, accumulated in float32 on-chip."""
    n = x.size
    if n == 0:
        return jnp.float32(0.0)

    rows = n // _LANES
    if (n % _LANES) != 0 or rows < _SUBLANES:
        # TODO(synk): element counts that are not a multiple of 128 would need an
        # HBM-side pad/slice copy (3x traffic) to reach the kernel; fall back to
        # XLA's fused reduction for this uncommon case.
        d = (x.astype(jnp.float32) - t.astype(jnp.float32)).reshape(-1)
        return jnp.sum(d * d)

    x2d = x.reshape(rows, _LANES)   # free reshape of a contiguous array
    t2d = t.reshape(rows, _LANES)

    itemsize = jnp.dtype(x.dtype).itemsize
    budget_rows = max(
        _SUBLANES,
        (tile_bytes // itemsize // _LANES) // _SUBLANES * _SUBLANES)

    tile_rows = min(budget_rows, (rows // _SUBLANES) * _SUBLANES)   # multiple of 8
    total_blocks = pl.cdiv(rows, tile_rows)

    # Prefer an even block count so the leading 'parallel' axis can shard the
    # reduction across both TensorCores on v7x (a no-op on 1-TC v5e/v6e).  Only
    # accept the adjustment when it keeps the grid exact (no empty blocks).
    if total_blocks >= 2 and total_blocks % 2 == 1:
        cand_blocks = total_blocks + 1
        cand_tile = min(_round_up(pl.cdiv(rows, cand_blocks), _SUBLANES), tile_rows)
        if pl.cdiv(rows, cand_tile) == cand_blocks:
            tile_rows, total_blocks = cand_tile, cand_blocks

    num_splits = 2 if (total_blocks >= 2 and total_blocks % 2 == 0) else 1
    blocks_per_split = total_blocks // num_splits

    kernel = _make_kernel(tile_rows, blocks_per_split, num_splits,
                          total_blocks, rows)

    def in_map(c, i):
        return (c * blocks_per_split + i, 0)

    cost = pl.CostEstimate(
        flops=3 * n,
        transcendentals=0,
        bytes_accessed=2 * n * itemsize + num_splits * _SUBLANES * _LANES * 4,
    )

    partials = pl.pallas_call(
        kernel,
        out_shape=jax.ShapeDtypeStruct((num_splits * _SUBLANES, _LANES), jnp.float32),
        grid_spec=pltpu.PrefetchScalarGridSpec(
            num_scalar_prefetch=0,
            grid=(num_splits, blocks_per_split),
            in_specs=[
                pl.BlockSpec((tile_rows, _LANES), in_map),
                pl.BlockSpec((tile_rows, _LANES), in_map),
            ],
            out_specs=pl.BlockSpec((_SUBLANES, _LANES), lambda c, i: (c, 0)),
        ),
        compiler_params=pltpu.CompilerParams(
            dimension_semantics=("parallel", "arbitrary"),
            vmem_limit_bytes=_VMEM_LIMIT,
        ),
        cost_estimate=cost,
    )(x2d, t2d)
    return jnp.sum(partials)


def multi_scale_loss(input_tensor, target_tensor, scale_weights):
    """JAX/Pallas equivalent of MultiScaleLoss.forward (scale_factor == 1)."""
    assert input_tensor.shape == target_tensor.shape
    n_elem = input_tensor.size

    sq_sum = _sq_diff_sum(input_tensor, target_tensor)
    mse = sq_sum / jnp.float32(n_elem)

    # TODO(synk): scale_factor is undefined in the reference __init__; with
    # scale_factor == 1 the bilinear resize is the identity, every per-scale MSE
    # is identical, and the loop collapses to sum(scale_weights) * MSE.
    w = jnp.asarray(scale_weights, jnp.float32)
    return jnp.sum(w) * mse


if __name__ == "__main__":
    key = jax.random.PRNGKey(0)
    k1, k2, k3, k4, k5, k6 = jax.random.split(key, 6)

    scale_weights = jnp.array([1.0, 0.5, 0.25, 0.125], dtype=jnp.float32)

    def ref_loss(x, t, w):
        d = x.astype(jnp.float32) - t.astype(jnp.float32)
        return jnp.sum(w) * jnp.mean(d * d)

    # 1) NCHW, as in the PyTorch module (single-block kernel path).
    x = jax.random.normal(k1, (2, 4, 16, 16), dtype=jnp.float32)
    t = jax.random.normal(k2, (2, 4, 16, 16), dtype=jnp.float32)
    loss = jax.block_until_ready(multi_scale_loss(x, t, scale_weights))
    assert jnp.allclose(loss, ref_loss(x, t, scale_weights), rtol=1e-5, atol=1e-6)

    # 2) Multi-block + ragged last block + two-split path (small tile budget).
    x2 = jax.random.normal(k3, (2, 4, 11, 128), dtype=jnp.float32)   # rows = 88
    t2 = jax.random.normal(k4, (2, 4, 11, 128), dtype=jnp.float32)
    got = jax.block_until_ready(
        _sq_diff_sum(x2, t2, tile_bytes=16 * _LANES * 4))            # 16-row tiles
    want = jnp.sum((x2 - t2) ** 2)
    assert jnp.allclose(got, want, rtol=1e-4, atol=1e-4), (got, want)

    # 3) Element count not a multiple of 128 -> documented XLA fallback path.
    x3 = jax.random.normal(k5, (3, 5, 7, 9), dtype=jnp.float32)
    t3 = jax.random.normal(k6, (3, 5, 7, 9), dtype=jnp.float32)
    loss3 = jax.block_until_ready(multi_scale_loss(x3, t3, scale_weights))
    assert jnp.allclose(loss3, ref_loss(x3, t3, scale_weights), rtol=1e-5, atol=1e-6)

    # 4) bf16 inputs (byte-budget tiling keeps blocks at ~4 MiB regardless of dtype).
    xb = x.astype(jnp.bfloat16)
    tb = t.astype(jnp.bfloat16)
    lossb = jax.block_until_ready(multi_scale_loss(xb, tb, scale_weights))
    assert jnp.allclose(lossb, ref_loss(xb, tb, scale_weights), rtol=1e-3, atol=1e-3)

    print("KERNEL_OK")
</pallas_src>

<mosaic_0001>
module attributes {stable_mosaic.version = 11 : i64} {
  func.func @kernel(%arg0: i32, %arg1: i32, %arg2: memref<16x128xf32, #tpu.memory_space<vmem>>, %arg3: memref<16x128xf32, #tpu.memory_space<vmem>>, %arg4: memref<8x128xf32, #tpu.memory_space<vmem>>) attributes {dimension_semantics = [#tpu.dimension_semantics<parallel>, #tpu.dimension_semantics<arbitrary>], iteration_bounds = array<i64: 1, 1>, scalar_prefetch = 0 : i64, scratch_operands = 0 : i64, tpu.core_type = #tpu.core_type<tc>, window_params = [{transform_indices = @transform_0, window_bounds = array<i64: 16, 128>}, {transform_indices = @transform_1, window_bounds = array<i64: 16, 128>}, {transform_indices = @transform_2, window_bounds = array<i64: 8, 128>}]} {
    %c0_i32 = arith.constant 0 : i32
    %0 = arith.cmpi eq, %arg1, %c0_i32 : i32
    %1 = arith.extui %0 : i1 to i32
    %c0_i32_0 = arith.constant 0 : i32
    %2 = arith.cmpi ne, %1, %c0_i32_0 : i32
    scf.if %2 {
      %cst_9 = arith.constant 0.000000e+00 : f32
      %14 = vector.broadcast %cst_9 : f32 to vector<8x128xf32>
      %c0_10 = arith.constant 0 : index
      %c0_11 = arith.constant 0 : index
      %15 = vector.load %arg4[%c0_10, %c0_11] : memref<8x128xf32, #tpu.memory_space<vmem>>, vector<8x128xf32>
      tpu.vector_store %arg4[%c0_10, %c0_11], %14 {strides = array<i32>} : memref<8x128xf32, #tpu.memory_space<vmem>>, vector<8x128xf32>,
    } else {
    }
    %c0 = arith.constant 0 : index
    %c0_1 = arith.constant 0 : index
    %3 = vector.load %arg4[%c0, %c0_1] : memref<8x128xf32, #tpu.memory_space<vmem>>, vector<8x128xf32>
    %cst = arith.constant 0.000000e+00 : f32
    %4 = vector.broadcast %cst : f32 to vector<8x128xf32>
    %c0_2 = arith.constant 0 : index
    %c0_3 = arith.constant 0 : index
    %5 = vector.load %arg2[%c0_2, %c0_3] : memref<16x128xf32, #tpu.memory_space<vmem>>, vector<16x128xf32>
    %c0_4 = arith.constant 0 : index
    %c0_5 = arith.constant 0 : index
    %6 = vector.load %arg3[%c0_4, %c0_5] : memref<16x128xf32, #tpu.memory_space<vmem>>, vector<16x128xf32>
    %7 = arith.subf %5, %6 : vector<16x128xf32>
    %8 = arith.mulf %7, %7 : vector<16x128xf32>
    %9 = vector.shape_cast %8 : vector<16x128xf32> to vector<2x8x128xf32>
    %cst_6 = arith.constant dense<0.000000e+00> : vector<8x128xf32>
    %10 = vector.multi_reduction <add>, %9, %cst_6 [0] : vector<2x8x128xf32> to vector<8x128xf32>
    %11 = arith.addf %4, %10 : vector<8x128xf32>
    %12 = arith.addf %3, %11 : vector<8x128xf32>
    %c0_7 = arith.constant 0 : index
    %c0_8 = arith.constant 0 : index
    %13 = vector.load %arg4[%c0_7, %c0_8] : memref<8x128xf32, #tpu.memory_space<vmem>>, vector<8x128xf32>
    tpu.vector_store %arg4[%c0_7, %c0_8], %12 {strides = array<i32>} : memref<8x128xf32, #tpu.memory_space<vmem>>, vector<8x128xf32>,
    return
  }
  func.func @transform_0(%arg0: i32, %arg1: i32) -> (i32, i32) {
    %c1_i32 = arith.constant 1 : i32
    %0 = arith.muli %arg0, %c1_i32 : i32
    %1 = arith.addi %0, %arg1 : i32
    %c0_i32 = arith.constant 0 : i32
    %c0_i32_0 = arith.constant 0 : i32
    return %1, %c0_i32 : i32, i32
  }
  func.func @transform_1(%arg0: i32, %arg1: i32) -> (i32, i32) {
    %c1_i32 = arith.constant 1 : i32
    %0 = arith.muli %arg0, %c1_i32 : i32
    %1 = arith.addi %0, %arg1 : i32
    %c0_i32 = arith.constant 0 : i32
    %c0_i32_0 = arith.constant 0 : i32
    return %1, %c0_i32 : i32, i32
  }
  func.func @transform_2(%arg0: i32, %arg1: i32) -> (i32, i32) {
    %c0_i32 = arith.constant 0 : i32
    %c0_i32_0 = arith.constant 0 : i32
    return %arg0, %c0_i32 : i32, i32
  }
}

</mosaic_0001>

<bundles_post_ra>
// kernel: tpu_custom_call.1
= control target key start
LH: loop header
LB: loop body
LE: loop exit
PB: predicated region body
PF: predicated region fallthrough
CT: control target
= control target key end

     0   :  { %7 = vsyncpa [#allocation3], 0  ;;  %s220_s0 = inlined_call_operand.hbm [shape: f32[16,128], index: 0, kind: input, shape index: {}]   ;;  %s221_s1 = inlined_call_operand.hbm [shape: f32[16,128], index: 1, kind: input, shape index: {}]   ;;  %s222_s2 = inlined_call_operand.hbm [shape: f32[8,128], index: 2, kind: output, shape index: {}]  }
   0x1   :  { %8 = vsyncpa [#allocation6], 0 }
   0x2   :  { %9 = vsyncpa [#allocation4], 0  ;;  %s164_s9 = smov [#allocation2]   ;;  %s92_s13 = scalar_lea.hbm %s220_s0, 256 }
   0x3   :  { %s19_s10 = sshll.u32 %s164_s9, 4  ;;  %p93_p0 = scmp.ne.s32.totalorder %s220_s0, %s92_s13  ;;  %s20_s10 = int_to_ptr.vmem [resolvable:$true] %s19_s10 }
   0x4   :  { %p96_p1 = scmp.lt.u32.totalorder %s92_s13, %s220_s0 }
   0x6   :  { %p98_p2 = pnand %p96_p1, %p93_p0 }
   0x8   :  { %101 = shalt.err (!%p98_p2)
}
   0x9   :  { %s102_s18 = scalar_lea.vmem %s20_s10, 256  ;;  %p107_p4 = scmp.lt.s32.totalorder %s20_s10, %s20_s10 }
   0xa   :  { %p103_p3 = scmp.ne.s32.totalorder %s20_s10, %s102_s18  ;;  %p108_p5 = scmp.lt.s32.totalorder %s102_s18, %s102_s18 }
   0xc   :  { %p109_p6 = por %p108_p5, %p107_p4 }
   0xe   :  { %p110_p7 = pnand %p109_p6, %p103_p3 }
  0x10   :  { %113 = shalt.err (!%p110_p7)
}
  0x11   :  { %s165_s19 = smov 128   ;;  %s166_s20 = smov 8  }
  0x12   :  { %25 = dma.hbm_to_vmem [thread:$0]  %s220_s0, 256, %s20_s10, [#allocation3], %s165_s19, %s165_s19, %s166_s20  }
  0x13   :  { %s167_s23 = smov [#allocation5]   ;;  %s114_s27 = scalar_lea.hbm %s221_s1, 256 }
  0x14   :  { %s35_s24 = sshll.u32 %s167_s23, 4  ;;  %p115_p8 = scmp.ne.s32.totalorder %s221_s1, %s114_s27  ;;  %s36_s24 = int_to_ptr.vmem [resolvable:$true] %s35_s24 }
  0x15   :  { %p118_p9 = scmp.lt.u32.totalorder %s114_s27, %s221_s1 }
  0x17   :  { %p120_p10 = pnand %p118_p9, %p115_p8 }
  0x19   :  { %123 = shalt.err (!%p120_p10)
}
  0x1a   :  { %s124_s4 = scalar_lea.vmem %s36_s24, 256  ;;  %p129_p12 = scmp.lt.s32.totalorder %s36_s24, %s36_s24 }
  0x1b   :  { %p125_p11 = scmp.ne.s32.totalorder %s36_s24, %s124_s4  ;;  %p130_p13 = scmp.lt.s32.totalorder %s124_s4, %s124_s4 }
  0x1d   :  { %p131_p0 = por %p130_p13, %p129_p12 }
  0x1f   :  { %p132_p1 = pnand %p131_p0, %p125_p11 }
  0x21   :  { %135 = shalt.err (!%p132_p1)
}
  0x22   :  { %41 = dma.hbm_to_vmem [thread:$0]  %s221_s1, 256, %s36_s24, [#allocation6], %s165_s19, %s165_s19, %s166_s20  }
  0x23   :  { %158 = dma.done.wait [#allocation3], 256  }
  0x24   :  { %159 = vsyncadd [#allocation3], 4294967040 }
  0x25   :  { %160 = dma.done.wait [#allocation6], 256  }
  0x26   :  { %161 = vsyncadd [#allocation6], 4294967040  ;;  %v58_v0 = vld [vmem:[#allocation2] sm:$0xff]  ;;  %v59_v1 = vld [vmem:[#allocation2 + $0x8] sm:$0xff]  ;;  %s168_s6 = smov [#allocation7]  }
  0x27   :  { %v60_v2 = vld [vmem:[#allocation5] sm:$0xff]  ;;  %v61_v3 = vld [vmem:[#allocation5 + $0x8] sm:$0xff]  ;;  %s76_s7 = sshll.u32 %s168_s6, 4  ;;  %s77_s7 = int_to_ptr.vmem [resolvable:$true] %s76_s7 }
  0x28   :  { %v62_v4 = vsub.f32 %v58_v0, %v60_v2  ;;  %v63_v5 = vsub.f32 %v59_v1, %v61_v3  ;;  %s136_s8 = scalar_lea.vmem %s77_s7, 128  ;;  %p141_p3 = scmp.lt.s32.totalorder %s77_s7, %s77_s7 }
  0x29   :  { %p137_p2 = scmp.ne.s32.totalorder %s77_s7, %s136_s8  ;;  %p142_p4 = scmp.lt.s32.totalorder %s136_s8, %s136_s8 }
  0x2a   :  { %v64_v6 = vmul.f32 %v62_v4, %v62_v4  ;;  %v65_v7 = vmul.f32 %v63_v5, %v63_v5 }
  0x2b   :  { %p143_p5 = por %p142_p4, %p141_p3 }
  0x2c   :  { %v66_v8 = vadd.f32 %v65_v7, %v64_v6 }
  0x2d   :  { %p144_p6 = pnand %p143_p5, %p137_p2 }
  0x2e   :  { %69 = vst [vmem:[#allocation7] sm:$0xff] %v66_v8 }
  0x2f   :  { %147 = shalt.err (!%p144_p6)
}
  0x30   :  { %s148_s10 = scalar_lea.hbm %s222_s2, 128 }
  0x31   :  { %p149_p7 = scmp.ne.s32.totalorder %s222_s2, %s148_s10  ;;  %p152_p8 = scmp.lt.u32.totalorder %s148_s10, %s222_s2 }
  0x33   :  { %p154_p9 = pnand %p152_p8, %p149_p7 }
  0x35   :  { %157 = shalt.err (!%p154_p9)
}
  0x36   :  { %79 = dma.vmem_to_hbm [thread:$0]  %s77_s7, 128, %s222_s2, [#allocation4]  }
  0x37   :  { %162 = dma.done.wait [#allocation4], 128  }
  0x38   :  { %163 = vsyncadd [#allocation4], 4294967168 }
  0x39   :  { %83 = vsyncpa [#allocation3], 1 }
  0x3a   :  { %84 = vsyncpa [#allocation6], 1 }
  0x3b   :  { %85 = vsyncpa [#allocation4], 1 }

</bundles_post_ra>
